<compile_context>
chip_gen: v7x
topology: tpu7x:2x2x1
jax: 0.10.0
libtpu: 0.0.40
codegen_flags: <defaults>
</compile_context>

<pallas_src>
import jax
import jax.numpy as jnp
from jax.experimental import pallas as pl
from jax.experimental.pallas import tpu as pltpu


def _round_up(n: int, m: int) -> int:
    return ((n + m - 1) // m) * m


def fold_layernorm_into_linear(gamma, beta, w, b):
    """One-time parameter preprocessing (hoisted out of the per-call path).

    Folds the LayerNorm affine into the Linear sublayer:
        (gamma * z + beta) @ w + b == z @ (gamma[:, None] * w) + (beta @ w + b)
    pads the hidden dim to a lane-dense multiple of 128 and casts the weight
    to bf16 for the MXU.
    """
    H = w.shape[0]
    h_pad = _round_up(H, 128)
    w_eff = (gamma[:, None] * w).astype(jnp.float32)
    b_eff = (beta @ w + b).astype(jnp.float32)
    if h_pad != H:
        w_eff = jnp.pad(w_eff, ((0, h_pad - H), (0, h_pad - H)))
        b_eff = jnp.pad(b_eff, ((0, h_pad - H),))
    return w_eff.astype(jnp.bfloat16), b_eff.reshape(1, h_pad)


def _make_residual_kernel(h_real: int, h_pad: int, tn: int, n_tiles: int, eps: float):
    inv_n = 1.0 / h_real
    inv_nm1 = 1.0 / max(h_real - 1, 1)   # guard hidden == 1
    n_pad_lanes = h_pad - h_real

    def kernel(x_ref, w_ref, b_ref, o_ref, mean_ref, inv_ref):
        x = x_ref[...].astype(jnp.float32)                     # (tm, Hp)

        def compute_stats():
            # torch semantics: unbiased variance, eps added to std.
            mean = jnp.sum(x, axis=-1, keepdims=True) * inv_n  # (tm, 1)
            diff = x - mean
            sq = jnp.sum(diff * diff, axis=-1, keepdims=True)
            if n_pad_lanes:
                # Padded x lanes are zero => diff there == -mean; correct the
                # sum analytically instead of masking (no iota / select).
                sq = sq - n_pad_lanes * (mean * mean)
            std = jnp.sqrt(sq * inv_nm1)
            mean_ref[...] = mean
            # Per-row reciprocal on the EUP instead of a (tm, Hp) VPU divide.
            inv_ref[...] = pl.reciprocal(std + eps, approx=True)

        if n_tiles == 1:
            compute_stats()
        else:
            pl.when(pl.program_id(1) == 0)(compute_stats)

        # gamma/beta are folded into w/b by the wrapper; padded lanes of z are
        # harmless because the padded weight rows are zero.
        z = ((x - mean_ref[...]) * inv_ref[...]).astype(jnp.bfloat16)

        # --- sublayer: Linear(H -> H) column tile on the MXU ----------------
        y = jnp.dot(z, w_ref[...], preferred_element_type=jnp.float32)
        y = y + b_ref[...]

        if n_tiles == 1:
            xn = x
        else:
            col0 = pl.multiple_of(pl.program_id(1) * tn, 128)
            xn = x_ref[:, pl.ds(col0, tn)].astype(jnp.float32)

        # --- dropout (eval mode -> identity) + residual add ------------------
        o_ref[...] = (xn + y).astype(o_ref.dtype)

    return kernel


def residual_forward(x, w_folded, b_folded, *, eps=1e-6, tile_rows=512,
                     out_dtype=None):
    """x: (B, S, H) float32.  w_folded/b_folded: fold_layernorm_into_linear()."""
    B, S, H = x.shape
    M = B * S
    h_pad = w_folded.shape[0]
    assert h_pad % 128 == 0 and h_pad >= H
    out_dtype = x.dtype if out_dtype is None else out_dtype
    out_isz = jnp.dtype(out_dtype).itemsize

    # --- generation-aware VMEM budget ---------------------------------------
    try:
        phys = int(pltpu.get_tpu_info().vmem_capacity_bytes)
    except Exception:
        phys = 64 * 1024 * 1024                 # conservative (v7x per-TC)
    budget = (phys * 3) // 4                    # ~48 MiB v7x, ~96 MiB v5e/v6e

    # --- column-tile the weight so large H never collapses tile_rows --------
    k = h_pad // 128
    n_tiles, tn = 1, h_pad
    for cand in range(1, k + 1):
        if k % cand:
            continue
        n_tiles, tn = cand, h_pad // cand
        w_buf = 1 if cand == 1 else 2           # constant index -> 1 buffer
        if w_buf * h_pad * tn * 2 <= budget // 3:
            break
    w_buf = 1 if n_tiles == 1 else 2

    def vmem_need(tr):
        return (2 * tr * h_pad * 4              # x tile (f32), double-buffered
                + 2 * tr * tn * out_isz         # out tile, double-buffered
                + w_buf * h_pad * tn * 2        # bf16 weight tile(s)
                + w_buf * tn * 4                # bias tile(s)
                + 2 * tr * 128 * 4)             # mean/inv scratch (lane-padded)

    # --- row tile selection --------------------------------------------------
    m8 = _round_up(M, 8)
    req = max(8, min(int(tile_rows), m8))
    tile_rows = 8
    for tr in (1024, 512, 256, 128, 64, 32, 16, 8):
        if tr <= req and vmem_need(tr) <= budget:
            tile_rows = tr
            break
    # give both v7x TensorCores at least one row block when possible
    if (m8 + tile_rows - 1) // tile_rows < 2 and m8 >= 16:
        tile_rows = max(8, tile_rows // 2)
    # avoid wrapper-side row padding when tile_rows can snap to a divisor
    d = tile_rows
    while d > 8 and (m8 % d) != 0:
        d -= 8
    if (m8 % d) == 0 and 4 * d >= tile_rows:
        tile_rows, m_pad = d, m8
    else:
        m_pad = _round_up(M, tile_rows)

    need = vmem_need(tile_rows)
    vmem_limit = int(max(32 * 1024 * 1024,
                         min(phys - (8 << 20), need + (8 << 20))))

    # --- activations (only pad when unavoidable) -----------------------------
    x2 = x.reshape(M, H)
    if m_pad != M or h_pad != H:
        x2 = jnp.pad(x2, ((0, m_pad - M), (0, h_pad - H)))

    kernel = _make_residual_kernel(H, h_pad, tn, n_tiles, eps)
    grid = (m_pad // tile_rows, n_tiles)

    def call(single_buffer_const):
        const_kw = {}
        if single_buffer_const and n_tiles == 1:
            # weight/bias index_map is constant -> single buffer halves footprint
            const_kw = dict(pipeline_mode=pl.Buffered(1))
        return pl.pallas_call(
            kernel,
            out_shape=jax.ShapeDtypeStruct((m_pad, h_pad), out_dtype),
            grid_spec=pltpu.PrefetchScalarGridSpec(
                num_scalar_prefetch=0,
                grid=grid,
                in_specs=[
                    pl.BlockSpec((tile_rows, h_pad), lambda i, j: (i, 0)),  # x rows
                    pl.BlockSpec((h_pad, tn), lambda i, j: (0, j), **const_kw),
                    pl.BlockSpec((1, tn), lambda i, j: (0, j), **const_kw),
                ],
                out_specs=pl.BlockSpec((tile_rows, tn), lambda i, j: (i, j)),
                scratch_shapes=[pltpu.VMEM((tile_rows, 1), jnp.float32),   # mean
                                pltpu.VMEM((tile_rows, 1), jnp.float32)],  # 1/(std+eps)
            ),
            compiler_params=pltpu.CompilerParams(
                dimension_semantics=("parallel", "arbitrary"),
                vmem_limit_bytes=vmem_limit,
            ),
        )(x2, w_folded, b_folded)

    try:
        out = call(True)
    except Exception:
        # Fallback if this jax build rejects pl.Buffered(1) single-buffering.
        out = call(False)

    return out[:M, :H].reshape(B, S, H)


def _reference(x, gamma, beta, w, b, eps=1e-6):
    mean = jnp.mean(x, axis=-1, keepdims=True)
    var = jnp.sum((x - mean) ** 2, axis=-1, keepdims=True) / (x.shape[-1] - 1)
    std = jnp.sqrt(var)
    normed = gamma * (x - mean) / (std + eps) + beta
    y = jnp.einsum("bsh,hk->bsk", normed, w) + b
    return x + y


if __name__ == "__main__":
    B, S, H = 2, 8, 32
    key = jax.random.PRNGKey(0)
    kx, kw, kb, kg, kbe = jax.random.split(key, 5)

    x = jax.random.normal(kx, (B, S, H), dtype=jnp.float32)

    # LayerNorm params (init: ones/zeros) — perturbed slightly so the folded
    # affine path is actually exercised.
    gamma = 1.0 + 0.1 * jax.random.normal(kg, (H,), dtype=jnp.float32)
    beta = 0.1 * jax.random.normal(kbe, (H,), dtype=jnp.float32)

    # Deterministic sublayer (Linear H -> H) parameters
    w = jax.random.normal(kw, (H, H), dtype=jnp.float32) * 0.05
    b = jax.random.normal(kb, (H,), dtype=jnp.float32) * 0.05

    # One-time parameter preprocessing (per weight update at training time).
    w_folded, b_folded = fold_layernorm_into_linear(gamma, beta, w, b)
    w_folded = jax.block_until_ready(w_folded)

    out = residual_forward(x, w_folded, b_folded)
    out = jax.block_until_ready(out)

    ref = _reference(x, gamma, beta, w, b)
    assert out.shape == (B, S, H)
    # bf16 MXU inputs + approx reciprocal -> compare at bf16-GEMM tolerance.
    assert jnp.allclose(out, ref, atol=2e-2, rtol=2e-2), "mismatch vs reference"

    print("KERNEL_OK")
</pallas_src>

<mosaic_0001>
module attributes {stable_mosaic.version = 11 : i64} {
  func.func @kernel(%arg0: i32, %arg1: i32, %arg2: memref<8x128xf32, #tpu.memory_space<vmem>>, %arg3: memref<128x128xbf16, #tpu.memory_space<vmem>>, %arg4: memref<1x128xf32, #tpu.memory_space<vmem>>, %arg5: memref<8x128xf32, #tpu.memory_space<vmem>>, %arg6: memref<8x1xf32, #tpu.memory_space<vmem>>, %arg7: memref<8x1xf32, #tpu.memory_space<vmem>>) attributes {dimension_semantics = [#tpu.dimension_semantics<parallel>, #tpu.dimension_semantics<arbitrary>], iteration_bounds = array<i64: 2, 1>, scalar_prefetch = 0 : i64, scratch_operands = 2 : i64, tpu.core_type = #tpu.core_type<tc>, window_params = [{transform_indices = @transform_0, window_bounds = array<i64: 8, 128>}, {pipeline_mode = #tpu.pipeline_mode<synchronous>, transform_indices = @transform_1, window_bounds = array<i64: 128, 128>}, {pipeline_mode = #tpu.pipeline_mode<synchronous>, transform_indices = @transform_2, window_bounds = array<i64: 1, 128>}, {transform_indices = @transform_3, window_bounds = array<i64: 8, 128>}]} {
    %c0 = arith.constant 0 : index
    %c0_0 = arith.constant 0 : index
    %0 = vector.load %arg2[%c0, %c0_0] : memref<8x128xf32, #tpu.memory_space<vmem>>, vector<8x128xf32>
    %cst = arith.constant dense<0.000000e+00> : vector<8xf32>
    %1 = vector.multi_reduction <add>, %0, %cst [1] : vector<8x128xf32> to vector<8xf32>
    %2 = vector.shape_cast %1 : vector<8xf32> to vector<8x1xf32>
    %cst_1 = arith.constant 3.125000e-02 : f32
    %3 = vector.broadcast %cst_1 : f32 to vector<8x1xf32>
    %4 = arith.mulf %2, %3 : vector<8x1xf32>
    %5 = vector.broadcast %4 : vector<8x1xf32> to vector<8x128xf32>
    %6 = arith.subf %0, %5 : vector<8x128xf32>
    %7 = arith.mulf %6, %6 : vector<8x128xf32>
    %cst_2 = arith.constant dense<0.000000e+00> : vector<8xf32>
    %8 = vector.multi_reduction <add>, %7, %cst_2 [1] : vector<8x128xf32> to vector<8xf32>
    %9 = vector.shape_cast %8 : vector<8xf32> to vector<8x1xf32>
    %10 = arith.mulf %4, %4 : vector<8x1xf32>
    %cst_3 = arith.constant 9.600000e+01 : f32
    %11 = vector.broadcast %cst_3 : f32 to vector<8x1xf32>
    %12 = arith.mulf %11, %10 : vector<8x1xf32>
    %13 = arith.subf %9, %12 : vector<8x1xf32>
    %cst_4 = arith.constant 0.0322580636 : f32
    %14 = vector.broadcast %cst_4 : f32 to vector<8x1xf32>
    %15 = arith.mulf %13, %14 : vector<8x1xf32>
    %16 = math.sqrt %15 : vector<8x1xf32>
    %c0_5 = arith.constant 0 : index
    %c0_6 = arith.constant 0 : index
    %17 = vector.load %arg6[%c0_5, %c0_6] : memref<8x1xf32, #tpu.memory_space<vmem>>, vector<8x1xf32>
    tpu.vector_store %arg6[%c0_5, %c0_6], %4 {strides = array<i32>} : memref<8x1xf32, #tpu.memory_space<vmem>>, vector<8x1xf32>,
    %cst_7 = arith.constant 9.99999997E-7 : f32
    %18 = vector.broadcast %cst_7 : f32 to vector<8x1xf32>
    %19 = arith.addf %16, %18 : vector<8x1xf32>
    %20 = tpu.reciprocal %19 {approx = true} : vector<8x1xf32> -> vector<8x1xf32>
    %c0_8 = arith.constant 0 : index
    %c0_9 = arith.constant 0 : index
    %21 = vector.load %arg7[%c0_8, %c0_9] : memref<8x1xf32, #tpu.memory_space<vmem>>, vector<8x1xf32>
    tpu.vector_store %arg7[%c0_8, %c0_9], %20 {strides = array<i32>} : memref<8x1xf32, #tpu.memory_space<vmem>>, vector<8x1xf32>,
    %c0_10 = arith.constant 0 : index
    %c0_11 = arith.constant 0 : index
    %22 = vector.load %arg6[%c0_10, %c0_11] : memref<8x1xf32, #tpu.memory_space<vmem>>, vector<8x1xf32>
    %23 = vector.broadcast %22 : vector<8x1xf32> to vector<8x128xf32>
    %24 = arith.subf %0, %23 : vector<8x128xf32>
    %c0_12 = arith.constant 0 : index
    %c0_13 = arith.constant 0 : index
    %25 = vector.load %arg7[%c0_12, %c0_13] : memref<8x1xf32, #tpu.memory_space<vmem>>, vector<8x1xf32>
    %26 = vector.broadcast %25 : vector<8x1xf32> to vector<8x128xf32>
    %27 = arith.mulf %24, %26 : vector<8x128xf32>
    %28 = arith.truncf %27 : vector<8x128xf32> to vector<8x128xbf16>
    %c0_14 = arith.constant 0 : index
    %c0_15 = arith.constant 0 : index
    %29 = vector.load %arg3[%c0_14, %c0_15] : memref<128x128xbf16, #tpu.memory_space<vmem>>, vector<128x128xbf16>
    %cst_16 = arith.constant dense<0.000000e+00> : vector<8x128xf32>
    %30 = tpu.matmul %28, %29, %cst_16 {dimension_numbers = #tpu.dot_dimension_numbers<[1], [0], [0], [1], [0, 0, 1, 1], [], []>} : vector<8x128xbf16>, vector<128x128xbf16>, vector<8x128xf32> -> vector<8x128xf32>
    %c0_17 = arith.constant 0 : index
    %c0_18 = arith.constant 0 : index
    %31 = vector.load %arg4[%c0_17, %c0_18] : memref<1x128xf32, #tpu.memory_space<vmem>>, vector<1x128xf32>
    %32 = vector.broadcast %31 : vector<1x128xf32> to vector<8x128xf32>
    %33 = arith.addf %30, %32 : vector<8x128xf32>
    %34 = arith.addf %0, %33 : vector<8x128xf32>
    %c0_19 = arith.constant 0 : index
    %c0_20 = arith.constant 0 : index
    %35 = vector.load %arg5[%c0_19, %c0_20] : memref<8x128xf32, #tpu.memory_space<vmem>>, vector<8x128xf32>
    tpu.vector_store %arg5[%c0_19, %c0_20], %34 {strides = array<i32>} : memref<8x128xf32, #tpu.memory_space<vmem>>, vector<8x128xf32>,
    return
  }
  func.func @transform_0(%arg0: i32, %arg1: i32) -> (i32, i32) {
    %c0_i32 = arith.constant 0 : i32
    %c0_i32_0 = arith.constant 0 : i32
    return %arg0, %c0_i32 : i32, i32
  }
  func.func @transform_1(%arg0: i32, %arg1: i32) -> (i32, i32) {
    %c0_i32 = arith.constant 0 : i32
    %c0_i32_0 = arith.constant 0 : i32
    return %c0_i32, %arg1 : i32, i32
  }
  func.func @transform_2(%arg0: i32, %arg1: i32) -> (i32, i32) {
    %c0_i32 = arith.constant 0 : i32
    %c0_i32_0 = arith.constant 0 : i32
    return %c0_i32, %arg1 : i32, i32
  }
  func.func @transform_3(%arg0: i32, %arg1: i32) -> (i32, i32) {
    %c0_i32 = arith.constant 0 : i32
    return %arg0, %arg1 : i32, i32
  }
}

module attributes {stable_mosaic.version = 11 : i64} {
  func.func @kernel(%arg0: i32, %arg1: i32, %arg2: memref<8x128xf32, #tpu.memory_space<vmem>>, %arg3: memref<128x128xbf16, #tpu.memory_space<vmem>>, %arg4: memref<1x128xf32, #tpu.memory_space<vmem>>, %arg5: memref<8x128xf32, #tpu.memory_space<vmem>>, %arg6: memref<8x1xf32, #tpu.memory_space<vmem>>, %arg7: memref<8x1xf32, #tpu.memory_space<vmem>>) attributes {dimension_semantics = [#tpu.dimension_semantics<parallel>, #tpu.dimension_semantics<arbitrary>], iteration_bounds = array<i64: 2, 1>, scalar_prefetch = 0 : i64, scratch_operands = 2 : i64, tpu.core_type = #tpu.core_type<tc>, window_params = [{transform_indices = @transform_0, window_bounds = array<i64: 8, 128>}, {transform_indices = @transform_1, window_bounds = array<i64: 128, 128>}, {transform_indices = @transform_2, window_bounds = array<i64: 1, 128>}, {transform_indices = @transform_3, window_bounds = array<i64: 8, 128>}]} {
    %c0 = arith.constant 0 : index
    %c0_0 = arith.constant 0 : index
    %0 = vector.load %arg2[%c0, %c0_0] : memref<8x128xf32, #tpu.memory_space<vmem>>, vector<8x128xf32>
    %cst = arith.constant dense<0.000000e+00> : vector<8xf32>
    %1 = vector.multi_reduction <add>, %0, %cst [1] : vector<8x128xf32> to vector<8xf32>
    %2 = vector.shape_cast %1 : vector<8xf32> to vector<8x1xf32>
    %cst_1 = arith.constant 3.125000e-02 : f32
    %3 = vector.broadcast %cst_1 : f32 to vector<8x1xf32>
    %4 = arith.mulf %2, %3 : vector<8x1xf32>
    %5 = vector.broadcast %4 : vector<8x1xf32> to vector<8x128xf32>
    %6 = arith.subf %0, %5 : vector<8x128xf32>
    %7 = arith.mulf %6, %6 : vector<8x128xf32>
    %cst_2 = arith.constant dense<0.000000e+00> : vector<8xf32>
    %8 = vector.multi_reduction <add>, %7, %cst_2 [1] : vector<8x128xf32> to vector<8xf32>
    %9 = vector.shape_cast %8 : vector<8xf32> to vector<8x1xf32>
    %10 = arith.mulf %4, %4 : vector<8x1xf32>
    %cst_3 = arith.constant 9.600000e+01 : f32
    %11 = vector.broadcast %cst_3 : f32 to vector<8x1xf32>
    %12 = arith.mulf %11, %10 : vector<8x1xf32>
    %13 = arith.subf %9, %12 : vector<8x1xf32>
    %cst_4 = arith.constant 0.0322580636 : f32
    %14 = vector.broadcast %cst_4 : f32 to vector<8x1xf32>
    %15 = arith.mulf %13, %14 : vector<8x1xf32>
    %16 = math.sqrt %15 : vector<8x1xf32>
    %c0_5 = arith.constant 0 : index
    %c0_6 = arith.constant 0 : index
    %17 = vector.load %arg6[%c0_5, %c0_6] : memref<8x1xf32, #tpu.memory_space<vmem>>, vector<8x1xf32>
    tpu.vector_store %arg6[%c0_5, %c0_6], %4 {strides = array<i32>} : memref<8x1xf32, #tpu.memory_space<vmem>>, vector<8x1xf32>,
    %cst_7 = arith.constant 9.99999997E-7 : f32
    %18 = vector.broadcast %cst_7 : f32 to vector<8x1xf32>
    %19 = arith.addf %16, %18 : vector<8x1xf32>
    %20 = tpu.reciprocal %19 {approx = true} : vector<8x1xf32> -> vector<8x1xf32>
    %c0_8 = arith.constant 0 : index
    %c0_9 = arith.constant 0 : index
    %21 = vector.load %arg7[%c0_8, %c0_9] : memref<8x1xf32, #tpu.memory_space<vmem>>, vector<8x1xf32>
    tpu.vector_store %arg7[%c0_8, %c0_9], %20 {strides = array<i32>} : memref<8x1xf32, #tpu.memory_space<vmem>>, vector<8x1xf32>,
    %c0_10 = arith.constant 0 : index
    %c0_11 = arith.constant 0 : index
    %22 = vector.load %arg6[%c0_10, %c0_11] : memref<8x1xf32, #tpu.memory_space<vmem>>, vector<8x1xf32>
    %23 = vector.broadcast %22 : vector<8x1xf32> to vector<8x128xf32>
    %24 = arith.subf %0, %23 : vector<8x128xf32>
    %c0_12 = arith.constant 0 : index
    %c0_13 = arith.constant 0 : index
    %25 = vector.load %arg7[%c0_12, %c0_13] : memref<8x1xf32, #tpu.memory_space<vmem>>, vector<8x1xf32>
    %26 = vector.broadcast %25 : vector<8x1xf32> to vector<8x128xf32>
    %27 = arith.mulf %24, %26 : vector<8x128xf32>
    %28 = arith.truncf %27 : vector<8x128xf32> to vector<8x128xbf16>
    %c0_14 = arith.constant 0 : index
    %c0_15 = arith.constant 0 : index
    %29 = vector.load %arg3[%c0_14, %c0_15] : memref<128x128xbf16, #tpu.memory_space<vmem>>, vector<128x128xbf16>
    %cst_16 = arith.constant dense<0.000000e+00> : vector<8x128xf32>
    %30 = tpu.matmul %28, %29, %cst_16 {dimension_numbers = #tpu.dot_dimension_numbers<[1], [0], [0], [1], [0, 0, 1, 1], [], []>} : vector<8x128xbf16>, vector<128x128xbf16>, vector<8x128xf32> -> vector<8x128xf32>
    %c0_17 = arith.constant 0 : index
    %c0_18 = arith.constant 0 : index
    %31 = vector.load %arg4[%c0_17, %c0_18] : memref<1x128xf32, #tpu.memory_space<vmem>>, vector<1x128xf32>
    %32 = vector.broadcast %31 : vector<1x128xf32> to vector<8x128xf32>
    %33 = arith.addf %30, %32 : vector<8x128xf32>
    %34 = arith.addf %0, %33 : vector<8x128xf32>
    %c0_19 = arith.constant 0 : index
    %c0_20 = arith.constant 0 : index
    %35 = vector.load %arg5[%c0_19, %c0_20] : memref<8x128xf32, #tpu.memory_space<vmem>>, vector<8x128xf32>
    tpu.vector_store %arg5[%c0_19, %c0_20], %34 {strides = array<i32>} : memref<8x128xf32, #tpu.memory_space<vmem>>, vector<8x128xf32>,
    return
  }
  func.func @transform_0(%arg0: i32, %arg1: i32) -> (i32, i32) {
    %c0_i32 = arith.constant 0 : i32
    %c0_i32_0 = arith.constant 0 : i32
    return %arg0, %c0_i32 : i32, i32
  }
  func.func @transform_1(%arg0: i32, %arg1: i32) -> (i32, i32) {
    %c0_i32 = arith.constant 0 : i32
    %c0_i32_0 = arith.constant 0 : i32
    return %c0_i32, %arg1 : i32, i32
  }
  func.func @transform_2(%arg0: i32, %arg1: i32) -> (i32, i32) {
    %c0_i32 = arith.constant 0 : i32
    %c0_i32_0 = arith.constant 0 : i32
    return %c0_i32, %arg1 : i32, i32
  }
  func.func @transform_3(%arg0: i32, %arg1: i32) -> (i32, i32) {
    %c0_i32 = arith.constant 0 : i32
    return %arg0, %arg1 : i32, i32
  }
}

</mosaic_0001>

<bundles_post_ra>
// kernel: tpu_custom_call.1
= control target key start
LH: loop header
LB: loop body
LE: loop exit
PB: predicated region body
PF: predicated region fallthrough
CT: control target
= control target key end

     0   :  { %8 = vsyncpa [#allocation5], 0  ;;  %s1056_s0 = inlined_call_operand.hbm [shape: f32[16,128], index: 0, kind: input, shape index: {}]   ;;  %s1057_s1 = inlined_call_operand.hbm [shape: bf16[128,128], index: 1, kind: input, shape index: {}]   ;;  %s1058_s2 = inlined_call_operand.vmem [shape: f32[1,128], index: 2, kind: input, shape index: {}]   ;;  %s1059_s3 = inlined_call_operand.hbm [shape: f32[16,128], index: 3, kind: output, shape index: {}]  }
   0x1   :  { %10 = vsyncpa [#allocation5 + $0x1], 0 }
   0x2   :  { %11 = vsyncpa [#allocation8], 0 }
   0x3   :  { %12 = vsyncpa [#allocation6], 0 }
   0x4   :  { %14 = vsyncpa [#allocation6 + $0x1], 0  ;;  %s827_s12 = smov 0   ;;  %s829_s13 = smov 0  }
   0x5   :  { %s831_s14 = smov 0   ;;  %s833_s15 = smov 0  }
   0x6   :  { %s835_s16 = smov 0   ;;  %s837_s17 = smov 0  }
   0x7 LB: > { %s507_s18 = sadd.s32 4294967295, %s797_s17   ;;  %s508_s19 = sadd.s32 4294967294, %s797_s17   ;;  %s797_s17 = sphi %s837_s17, %s20_s17   ;;  %s793_s16 = sphi %s835_s16, %s1083_s16   ;;  %s789_s15 = sphi %s833_s15, %s1082_s15   ;;  %s785_s14 = sphi %s831_s14, %s1081_s14   ;;  %s781_s13 = sphi %s829_s13, %s1080_s13   ;;  %s777_s12 = sphi %s827_s12, %s1079_s12  }
   0x8   : > { %p52_p0 = scmp.ne.s32.totalorder %s781_s13, %s777_s12  ;;  %p861_p1 = scmp.eq.s32.totalorder %s507_s18, 0 }
   0x9   : > { %p865_p2 = scmp.eq.s32.totalorder %s507_s18, 1  ;;  %p136_p3 = scmp.eq.s32.totalorder %s508_s19, 1 }
   0xa   : > { %s1064_s20 = scalar_select %p861_p1, 1, 0 }
   0xb   : > { %s1065_s21 = scalar_select %p865_p2, 1, 0 }
   0xc   : > { %p871_p4 = por %p861_p1, %p52_p0  ;;  %p509_p5 = scmp.ge.s32.totalorder %s797_s17, 1 }
   0xd   : > { %p876_p6 = por %p136_p3, %p52_p0  ;;  %p143_p7 = scmp.lt.s32.totalorder %s797_s17, 3 }
   0xe   : > { %s1066_s22 = scalar_select %p871_p4, 1, 0 }
   0xf   : > { %s1067_s23 = scalar_select %p876_p6, 1, 0 }
  0x10   : > { %p881_p8 = pnand %p509_p5, %p143_p7  ;;  %s799_s25 = smov [#allocation7]  }
  0x11   : > { %s157_s26 = sshll.u32 %s799_s25, 4  ;;  %s32_s28 = sadd.s32 1, %s793_s16  ;;  %s158_s26 = int_to_ptr.vmem [resolvable:$true] %s157_s26 }
  0x12   : > { %s1068_s24 = scalar_select %p881_p8, 1, 0 }
  0x13   : > { %p569_p9 = pneg %p881_p8  ;;  %s653_s4 = scalar_lea.hbm %s1057_s1, 1024 }
  0x14   : > { %p654_p12 = scmp.ne.s32.totalorder %s1057_s1, %s653_s4  ;;  %p660_p5 = scmp.lt.u32.totalorder %s653_s4, %s1057_s1 }
  0x15   : > { %p890_p11 = pnand %p569_p9, %p861_p1 }
  0x17   : > { %p655_p13 = pneg %p890_p11 }
  0x19   : > { %p656_p0 = pnand %p655_p13, %p654_p12 }
  0x1b   : > { %p657_p3 = pneg %p656_p0 }
  0x1d   : > { %p662_p7 = pnand %p660_p5, %p657_p3 }
  0x1f   : > { %665 = shalt.err (!%p662_p7)
}
  0x20   : > { %s666_s9 = scalar_lea.vmem %s158_s26, 1024  ;;  %p674_p1 = scmp.lt.s32.totalorder %s158_s26, %s158_s26 }
  0x21   : > { %p667_p9 = scmp.ne.s32.totalorder %s158_s26, %s666_s9  ;;  %p675_p4 = scmp.lt.s32.totalorder %s666_s9, %s666_s9 }
  0x23   : > { %p669_p10 = pnand %p667_p9, %p655_p13  ;;  %p676_p8 = por %p675_p4, %p674_p1 }
  0x25   : > { %p670_p6 = pneg %p669_p10 }
  0x27   : > { %p677_p2 = pnand %p676_p8, %p670_p6 }
  0x29   : > { %680 = shalt.err (!%p677_p2)
}
  0x2a   : > { %s800_s10 = smov 64   ;;  %s801_s11 = smov 4  }
  0x2b   : > { %572 = dma.hbm_to_vmem [thread:$0]  (!%p890_p11), %s1057_s1, 1024, %s158_s26, [#allocation8], %s800_s10, %s800_s10, %s801_s11  }
  0x2c   : > { %p34_p1 = scmp.ge.s32.totalorder %s32_s28, 2  ;;  %s39_s25 = sadd.s32 1, %s785_s14 }
  0x2d   : > { %p46_p2 = scmp.ne.s32.totalorder %s785_s14, %s781_s13  ;;  %p47_p4 = scmp.eq.s32.totalorder %s797_s17, 0 }
  0x2e   : > { %s1085_s28 = smov (%p34_p1, %s32_s28), 0  ;;  %p1071_p8 = scmp.ne.s32.totalorder %s1065_s21, 0 }
  0x2f   : > { %p917_p6 = por %p47_p4, %p46_p2  ;;  %s36_s27 = ssub.s32 %s793_s16, %s1085_s28 }
  0x30   : > { %p923_p10 = por %p1071_p8, %p46_p2  ;;  %p582_p12 = scmp.lt.s32.totalorder %s797_s17, 2 }
  0x31   : > { %p37_p11 = scmp.eq.s32.totalorder %s36_s27, 0  ;;  %s177_s26 = sand.u32 1, %s785_s14  }
  0x32   : > { %s513_s4 = sshll.u32 %s177_s26, 3  ;;  %s514_s6 = sshll.u32 %s793_s16, 7 }
  0x33   : > { %s932_s5 = scalar_select %p37_p11, %s785_s14, %s39_s25  }
  0x34   : > { %s938_s9 = scalar_lea.hbm %s1056_s0, %s514_s6  ;;  %s181_s21 = scalar_lea.vmem [#allocation4], %s513_s4 }
  0x35   : > { %s188_s10 = sshll.u32 %s181_s21, 4  ;;  %p944_p13 = pnand %p582_p12, %p917_p6  ;;  %s940_s10 = int_to_ptr.vmem [resolvable:$true] %s188_s10 }
  0x36   : > { %s178_s18 = scalar_lea.sflag [#allocation5], %s177_s26  ;;  %s681_s19 = scalar_lea.hbm %s938_s9, 128 }
  0x37   : > { %p682_p0 = scmp.ne.s32.totalorder %s938_s9, %s681_s19  ;;  %p683_p3 = pneg %p944_p13 }
  0x38   : > { %s686_s4 = scalar_lea.hbm %s1056_s0, 256  ;;  %p687_p9 = scmp.lt.u32.totalorder %s938_s9, %s1056_s0 }
  0x39   : > { %p684_p5 = pnand %p683_p3, %p682_p0  ;;  %p688_p1 = scmp.lt.u32.totalorder %s686_s4, %s681_s19 }
  0x3a   : > { %p690_p4 = scmp.lt.u32.totalorder %s681_s19, %s938_s9 }
  0x3b   : > { %p685_p7 = pneg %p684_p5  ;;  %p689_p2 = por %p688_p1, %p687_p9 }
  0x3d   : > { %p691_p6 = por %p690_p4, %p689_p2 }
  0x3f   : > { %p692_p8 = pnand %p691_p6, %p685_p7 }
  0x41   : > { %695 = shalt.err (!%p692_p8)
}
  0x42   : > { %s696_s26 = scalar_lea.vmem %s940_s10, 128  ;;  %s802_s7 = smov [#allocation4]  }
  0x43   : > { %p697_p12 = scmp.ne.s32.totalorder %s940_s10, %s696_s26  ;;  %s701_s8 = sshll.u32 %s802_s7, 4  ;;  %s702_s8 = int_to_ptr.vmem [resolvable:$false] %s701_s8 }
  0x44   : > { %s703_s21 = scalar_lea.vmem %s702_s8, 256  ;;  %p704_p5 = scmp.lt.s32.totalorder %s940_s10, %s702_s8 }
  0x45   : > { %p699_p11 = pnand %p697_p12, %p683_p3  ;;  %p705_p9 = scmp.lt.s32.totalorder %s703_s21, %s696_s26 }
  0x47   : > { %p700_p0 = pneg %p699_p11  ;;  %p706_p1 = por %p705_p9, %p704_p5 }
  0x49   : > { %p707_p2 = pnand %p706_p1, %p700_p0 }
  0x4b   : > { %710 = shalt.err (!%p707_p2)
}
  0x4c   : > { %576 = dma.hbm_to_vmem [thread:$0]  (!%p944_p13), %s938_s9, 128, %s940_s10, %s178_s18  }
  0x4d   : > { %p1074_p7 = scmp.ne.s32.totalorder %s1068_s24, 0 }
  0x4e   : > { %s976_s19 = sand.u32 (!%p1074_p7), 1, %s781_s13   ;;  %p1075_p3 = scmp.ne.s32.totalorder (!%p1074_p7), %s1066_s22, 0 }
  0x4f   : > { %197 = sbr.rel (%p1074_p7) target bundleno = 783 (0x30f), region = 32  ;;  %s516_s25 = sshll.u32 (!%p1074_p7), %s976_s19, 3 }
  0x50   : > { %s200_s27 = scalar_lea.sflag (!%p1074_p7), [#allocation5], %s976_s19  ;;  %s203_s4 = scalar_lea.vmem (!%p1074_p7), [#allocation4], %s516_s25 }
  0x56   : > { %764 = dma.done.wait (%p1075_p3), %s200_s27, 128  }
  0x57   : > { %766 = vsyncadd (%p1075_p3), %s200_s27, 4294967168  ;;  %p1076_p13 = scmp.ne.s32.totalorder %s1064_s20, 0 }
  0x59   : > { %768 = dma.done.wait (%p1076_p13), [#allocation8], 1024  }
  0x5a   : > { %770 = vsyncadd (%p1076_p13), [#allocation8], 4294966272  ;;  %v990_v0 = vld [vmem:[%s203_s4] sm:$0xff]  ;;  %v803_v1 = vmov 0   ;;  %vm256_vm0 = vcmask 7168   ;;  %v641_v7 = vld [vmem:[#allocation7] sm:$0xff]  }
  0x5b   : > { %238 = vadd.xlane.f32.xlu0 %v990_v0  ;;  %639 = vset.pattern.permute.xlu1 %v803_v1  ;;  %v804_v8 = vmov 0.0   ;;  %v642_v9 = vld [vmem:[#allocation7 + $0x8] sm:$0xff]   ;;  %v643_v10 = vld [vmem:[#allocation7 + $0x10] sm:$0xff]   ;;  %v644_v11 = vld [vmem:[#allocation7 + $0x18] sm:$0xff]   ;;  %vm805_vm3 = vmmov 0   ;;  %s529_s24 = sshll.u32 %s789_s15, 7 }
  0x5c   : > { %640 = vset.pattern.permute.xlu0 %v803_v1  ;;  %541 = vmatprep.subr.bf16.mxu0 %v804_v8  ;;  %v645_v12 = vld [vmem:[#allocation7 + $0x20] sm:$0xff]   ;;  %v646_v13 = vld [vmem:[#allocation7 + $0x28] sm:$0xff]   ;;  %v647_v14 = vld [vmem:[#allocation7 + $0x30] sm:$0xff]   ;;  %s232_s9 = scalar_lea.vmem [#allocation9], %s516_s25  ;;  %s1007_s29 = scalar_lea.hbm %s1059_s3, %s529_s24 }
  0x5d   : > { %542 = vmatpush3.bf16.msra.mxu0 %v641_v7  ;;  %v648_v28 = vld [vmem:[#allocation7 + $0x38] sm:$0xff]   ;;  %557 = vmatprep.mubr.msk.bf16.mxu0 %vm805_vm3, %v804_v8  ;;  %v519_v34 = vld [vmem:[%s1058_s2] ss:$0 sm:$0xff]  ;;  %s404_s10 = sshll.u32 %s232_s9, 4  ;;  %s390_s15 = scalar_lea.sflag [#allocation6], %s976_s19  ;;  %s1009_s10 = int_to_ptr.vmem [resolvable:$true] %s404_s10 }
  0x5e   : > { %543 = vmatprep.subr.bf16.mxu0 %v804_v8  ;;  %s711_s6 = scalar_lea.vmem %s1009_s10, 128  ;;  %s806_s26 = smov [#allocation9]  }
  0x5f   : > { %p712_p4 = scmp.ne.s32.totalorder %s1009_s10, %s711_s6  ;;  %s715_s7 = sshll.u32 %s806_s26, 4  ;;  %s716_s7 = int_to_ptr.vmem [resolvable:$false] %s715_s7 }
  0x60   : > { %s717_s8 = scalar_lea.vmem %s716_s7, 256  ;;  %p718_p12 = scmp.lt.s32.totalorder %s1009_s10, %s716_s7 }
  0x61   : > { %544 = vmatpush3.bf16.msra.mxu0 %v642_v9  ;;  %p713_p6 = pnand %p712_p4, %p923_p10  ;;  %p719_p11 = scmp.lt.s32.totalorder %s717_s8, %s711_s6 }
  0x62   : > { %545 = vmatprep.subr.bf16.mxu0 %v804_v8 }
  0x63   : > { %p714_p8 = pneg %p713_p6  ;;  %p720_p0 = por %p719_p11, %p718_p12 }
  0x65   : > { %546 = vmatpush3.bf16.msra.mxu0 %v643_v10  ;;  %p721_p5 = pnand %p720_p0, %p714_p8 }
  0x66   : > { %547 = vmatprep.subr.bf16.mxu0 %v804_v8 }
  0x69   : > { %548 = vmatpush3.bf16.msra.mxu0 %v644_v11 }
  0x6a   : > { %549 = vmatprep.subr.bf16.mxu0 %v804_v8 }
  0x6d   : > { %550 = vmatpush3.bf16.msra.mxu0 %v645_v12 }
  0x6e   : > { %551 = vmatprep.subr.bf16.mxu0 %v804_v8 }
  0x71   : > { %552 = vmatpush3.bf16.msra.mxu0 %v646_v13 }
  0x72   : > { %553 = vmatprep.subr.bf16.mxu0 %v804_v8 }
  0x75   : > { %554 = vmatpush3.bf16.msra.mxu0 %v647_v14 }
  0x76   : > { %555 = vmatprep.subr.bf16.mxu0 %v804_v8 }
  0x79   : > { %556 = vmatpush3.bf16.msra.mxu0 %v648_v28 }
  0xe8   : > { %v239_v2 = vpop.xlane.xlu0 %238 }
  0xe9   : > { %v240_v3 = vmul.f32 0.03125, %v239_v2 }
  0xeb   : > { %257 = vst.msk [vmem:[#allocation2] sm:$0xff] %vm256_vm0, %v240_v3  ;;  %v241_v4 = vsub.f32 %v990_v0, %v240_v3  ;;  %v245_v15 = vmul.f32 %v240_v3, %v240_v3 }
  0xed   : > { %v242_v5 = vmul.f32 %v241_v4, %v241_v4  ;;  %v246_v16 = vmul.f32 96.0, %v245_v15 }
  0xef   : > { %243 = vadd.xlane.f32.xlu0 %v242_v5 }
  0xf2   : > { %v261_v6 = vld [vmem:[#allocation2] sm:$0xff] }
  0xf3   : > { %264 = vperm.xlu1 %639, %v261_v6  }
 0x172   : > { %v265_v29 = vpop.permute.xlu1 %264 }
 0x173   : > { %v267_v30 = vsub.f32 %v990_v0, %v265_v29 }
 0x17c   : > { %v244_v17 = vpop.xlane.xlu0 %243 }
 0x17d   : > { %v247_v18 = vsub.f32 %v244_v17, %v246_v16 }
 0x17f   : > { %v248_v19 = vmul.f32 0.032258064, %v247_v18 }
 0x181   : > { %649 = vrsqrt.f32 %v248_v19  ;;  %vm251_vm1 = vcmp.eq.f32.partialorder %v248_v19, inf  ;;  %v254_v22 = vand.u32 2147483648, %v248_v19  ;;  %vm253_vm2 = vcmp.eq.f32.partialorder %v248_v19, 0.0 }
 0x18b   : > { %v650_v20 = vpop.eup %649 }
 0x18c   : > { %v250_v21 = vmul.f32 %v650_v20, %v248_v19 }
 0x18e   : > { %v252_v23 = vsel %vm251_vm1, %v248_v19, %v250_v21 }
 0x18f   : > { %v255_v24 = vsel %vm253_vm2, %v254_v22, %v252_v23 }
 0x190   : > { %v258_v25 = vadd.f32 1e-06, %v255_v24 }
 0x192   : > { %651 = vrcp.f32 %v258_v25 }
 0x19c   : > { %v652_v26 = vpop.eup %651 }
 0x19d   : > { %260 = vst.msk [vmem:[#allocation3] sm:$0xff] %vm256_vm0, %v652_v26 }
 0x1a4   : > { %v268_v27 = vld [vmem:[#allocation3] sm:$0xff] }
 0x1a5   : > { %271 = vperm.xlu1 %639, %v268_v27  }
 0x224   : > { %v272_v31 = vpop.permute.xlu1 %271 }
 0x225   : > { %v274_v32 = vmul.f32 %v272_v31, %v267_v30 }
 0x227   : > { %v275_v33 = vpack.c.bf16 %v274_v32, %v274_v32 }
 0x229   : > { %558 = vmatmul.mubr.bf16.vlgmr.msra.gmra.mrb[0].mxu0 %v275_v33 }
 0x2fc   : > { %v381_v35 = vpop.f32.mrb[0].mxu0 }
 0x2fd   : > { %v382_v36 = vadd.f32 %v519_v34, %v381_v35  ;;  %v559_v37 = vpop.f32.mrb[1].mxu0 }
 0x2fe   : > { %v384_v38 = vpop.f32.mrb[2].mxu0 }
 0x2ff   : > { %v387_v39 = vadd.f32 %v382_v36, %v990_v0  ;;  %v560_v40 = vpop.f32.mrb[3].mxu0 }
 0x301   : > { %388 = vst [vmem:[%s232_s9] sm:$0xff] %v387_v39 }
 0x302   : > { %724 = shalt.err (!%p721_p5)
}
 0x303   : > { %s725_s21 = scalar_lea.hbm %s1007_s29, 128  ;;  %s729_s27 = scalar_lea.hbm %s1059_s3, 256 }
 0x304   : > { %p726_p9 = scmp.ne.s32.totalorder %s1007_s29, %s725_s21  ;;  %p730_p7 = scmp.lt.u32.totalorder %s1007_s29, %s1059_s3 }
 0x305   : > { %p731_p3 = scmp.lt.u32.totalorder %s729_s27, %s725_s21  ;;  %p733_p4 = scmp.lt.u32.totalorder %s725_s21, %s1007_s29 }
 0x306   : > { %p727_p1 = pnand %p726_p9, %p923_p10 }
 0x307   : > { %p732_p13 = por %p731_p3, %p730_p7 }
 0x308   : > { %p728_p2 = pneg %p727_p1 }
 0x309   : > { %p734_p6 = por %p733_p4, %p732_p13 }
 0x30b   : > { %p735_p8 = pnand %p734_p6, %p728_p2 }
 0x30d   : > { %738 = shalt.err (!%p735_p8)
}
 0x30e   : > { %567 = dma.vmem_to_hbm [thread:$0]  (%p923_p10), %s1009_s10, 128, %s1007_s29, %s390_s15  }
 0x30f PF: > { %s416_s22 = sand.u32 1, %s777_s12   ;;  %p1077_p12 = scmp.ne.s32.totalorder %s1067_s23, 0 }
 0x310   : > { %p1078_p11 = scmp.ge.s32.totalorder %s797_s17, 2  ;;  %s417_s24 = scalar_lea.sflag [#allocation6], %s416_s22 }
 0x312   : > { %p578_p0 = pnand %p1078_p11, %p1077_p12 }
 0x314   : > { %772 = dma.done.wait (!%p578_p0), %s417_s24, 128  }
 0x315   : > { %774 = vsyncadd (!%p578_p0), %s417_s24, 4294967168  ;;  %s20_s17 = sadd.s32 1, %s797_s17   ;;  %s1079_s12 = smov %s781_s13 }
 0x316   : > { %p17_p5 = scmp.ge.s32.totalorder %s20_s17, 4   ;;  %s1080_s13 = smov %s785_s14 }
 0x317   : > { %s1081_s14 = smov %s932_s5  ;;  %s1082_s15 = smov %s793_s16 }
 0x318   : > { %s1083_s16 = smov %s1085_s28  ;;  %19 = sbr.rel (!%p17_p5) target bundleno = 7 (0x7), region = 85 }
 0x31f   :  { %422 = vsyncpa [#allocation5], 1 }
 0x320   :  { %424 = vsyncpa [#allocation5 + $0x1], 1 }
 0x321   :  { %425 = vsyncpa [#allocation8], 1 }
 0x322   :  { %426 = vsyncpa [#allocation6], 1 }
 0x323   :  { %428 = vsyncpa [#allocation6 + $0x1], 1 }

// kernel: tpu_custom_call.1
= control target key start
LH: loop header
LB: loop body
LE: loop exit
PB: predicated region body
PF: predicated region fallthrough
CT: control target
= control target key end

     0   :  { %8 = vsyncpa [#allocation5], 0  ;;  %s1056_s0 = inlined_call_operand.hbm [shape: f32[16,128], index: 0, kind: input, shape index: {}]   ;;  %s1057_s1 = inlined_call_operand.hbm [shape: bf16[128,128], index: 1, kind: input, shape index: {}]   ;;  %s1058_s2 = inlined_call_operand.vmem [shape: f32[1,128], index: 2, kind: input, shape index: {}]   ;;  %s1059_s3 = inlined_call_operand.hbm [shape: f32[16,128], index: 3, kind: output, shape index: {}]  }
   0x1   :  { %10 = vsyncpa [#allocation5 + $0x1], 0 }
   0x2   :  { %11 = vsyncpa [#allocation8], 0 }
   0x3   :  { %12 = vsyncpa [#allocation6], 0 }
   0x4   :  { %14 = vsyncpa [#allocation6 + $0x1], 0  ;;  %s827_s12 = smov 0   ;;  %s829_s13 = smov 0  }
   0x5   :  { %s831_s14 = smov 0   ;;  %s833_s15 = smov 0  }
   0x6   :  { %s835_s16 = smov 0   ;;  %s837_s17 = smov 0  }
   0x7 LB: > { %s507_s18 = sadd.s32 4294967295, %s797_s17   ;;  %s508_s19 = sadd.s32 4294967294, %s797_s17   ;;  %s797_s17 = sphi %s837_s17, %s20_s17   ;;  %s793_s16 = sphi %s835_s16, %s1083_s16   ;;  %s789_s15 = sphi %s833_s15, %s1082_s15   ;;  %s785_s14 = sphi %s831_s14, %s1081_s14   ;;  %s781_s13 = sphi %s829_s13, %s1080_s13   ;;  %s777_s12 = sphi %s827_s12, %s1079_s12  }
   0x8   : > { %p52_p0 = scmp.ne.s32.totalorder %s781_s13, %s777_s12  ;;  %p861_p1 = scmp.eq.s32.totalorder %s507_s18, 0 }
   0x9   : > { %p865_p2 = scmp.eq.s32.totalorder %s507_s18, 1  ;;  %p136_p3 = scmp.eq.s32.totalorder %s508_s19, 1 }
   0xa   : > { %s1064_s20 = scalar_select %p861_p1, 1, 0 }
   0xb   : > { %s1065_s21 = scalar_select %p865_p2, 1, 0 }
   0xc   : > { %p871_p4 = por %p861_p1, %p52_p0  ;;  %p509_p5 = scmp.ge.s32.totalorder %s797_s17, 1 }
   0xd   : > { %p876_p6 = por %p136_p3, %p52_p0  ;;  %p143_p7 = scmp.lt.s32.totalorder %s797_s17, 3 }
   0xe   : > { %s1066_s22 = scalar_select %p871_p4, 1, 0 }
   0xf   : > { %s1067_s23 = scalar_select %p876_p6, 1, 0 }
  0x10   : > { %p881_p8 = pnand %p509_p5, %p143_p7  ;;  %s799_s25 = smov [#allocation7]  }
  0x11   : > { %s157_s26 = sshll.u32 %s799_s25, 4  ;;  %s32_s28 = sadd.s32 1, %s793_s16  ;;  %s158_s26 = int_to_ptr.vmem [resolvable:$true] %s157_s26 }
  0x12   : > { %s1068_s24 = scalar_select %p881_p8, 1, 0 }
  0x13   : > { %p569_p9 = pneg %p881_p8  ;;  %s653_s4 = scalar_lea.hbm %s1057_s1, 1024 }
  0x14   : > { %p654_p12 = scmp.ne.s32.totalorder %s1057_s1, %s653_s4  ;;  %p660_p5 = scmp.lt.u32.totalorder %s653_s4, %s1057_s1 }
  0x15   : > { %p890_p11 = pnand %p569_p9, %p861_p1 }
  0x17   : > { %p655_p13 = pneg %p890_p11 }
  0x19   : > { %p656_p0 = pnand %p655_p13, %p654_p12 }
  0x1b   : > { %p657_p3 = pneg %p656_p0 }
  0x1d   : > { %p662_p7 = pnand %p660_p5, %p657_p3 }
  0x1f   : > { %665 = shalt.err (!%p662_p7)
}
  0x20   : > { %s666_s9 = scalar_lea.vmem %s158_s26, 1024  ;;  %p674_p1 = scmp.lt.s32.totalorder %s158_s26, %s158_s26 }
  0x21   : > { %p667_p9 = scmp.ne.s32.totalorder %s158_s26, %s666_s9  ;;  %p675_p4 = scmp.lt.s32.totalorder %s666_s9, %s666_s9 }
  0x23   : > { %p669_p10 = pnand %p667_p9, %p655_p13  ;;  %p676_p8 = por %p675_p4, %p674_p1 }
  0x25   : > { %p670_p6 = pneg %p669_p10 }
  0x27   : > { %p677_p2 = pnand %p676_p8, %p670_p6 }
  0x29   : > { %680 = shalt.err (!%p677_p2)
}
  0x2a   : > { %s800_s10 = smov 64   ;;  %s801_s11 = smov 4  }
  0x2b   : > { %572 = dma.hbm_to_vmem [thread:$0]  (!%p890_p11), %s1057_s1, 1024, %s158_s26, [#allocation8], %s800_s10, %s800_s10, %s801_s11  }
  0x2c   : > { %p34_p1 = scmp.ge.s32.totalorder %s32_s28, 2  ;;  %s39_s25 = sadd.s32 1, %s785_s14 }
  0x2d   : > { %p46_p2 = scmp.ne.s32.totalorder %s785_s14, %s781_s13  ;;  %p47_p4 = scmp.eq.s32.totalorder %s797_s17, 0 }
  0x2e   : > { %s1085_s28 = smov (%p34_p1, %s32_s28), 0  ;;  %p1071_p8 = scmp.ne.s32.totalorder %s1065_s21, 0 }
  0x2f   : > { %p917_p6 = por %p47_p4, %p46_p2  ;;  %s36_s27 = ssub.s32 %s793_s16, %s1085_s28 }
  0x30   : > { %p923_p10 = por %p1071_p8, %p46_p2  ;;  %p582_p12 = scmp.lt.s32.totalorder %s797_s17, 2 }
  0x31   : > { %p37_p11 = scmp.eq.s32.totalorder %s36_s27, 0  ;;  %s177_s26 = sand.u32 1, %s785_s14  }
  0x32   : > { %s513_s4 = sshll.u32 %s177_s26, 3  ;;  %s514_s6 = sshll.u32 %s793_s16, 7 }
  0x33   : > { %s932_s5 = scalar_select %p37_p11, %s785_s14, %s39_s25  }
  0x34   : > { %s938_s9 = scalar_lea.hbm %s1056_s0, %s514_s6  ;;  %s181_s21 = scalar_lea.vmem [#allocation4], %s513_s4 }
  0x35   : > { %s188_s10 = sshll.u32 %s181_s21, 4  ;;  %p944_p13 = pnand %p582_p12, %p917_p6  ;;  %s940_s10 = int_to_ptr.vmem [resolvable:$true] %s188_s10 }
  0x36   : > { %s178_s18 = scalar_lea.sflag [#allocation5], %s177_s26  ;;  %s681_s19 = scalar_lea.hbm %s938_s9, 128 }
  0x37   : > { %p682_p0 = scmp.ne.s32.totalorder %s938_s9, %s681_s19  ;;  %p683_p3 = pneg %p944_p13 }
  0x38   : > { %s686_s4 = scalar_lea.hbm %s1056_s0, 256  ;;  %p687_p9 = scmp.lt.u32.totalorder %s938_s9, %s1056_s0 }
  0x39   : > { %p684_p5 = pnand %p683_p3, %p682_p0  ;;  %p688_p1 = scmp.lt.u32.totalorder %s686_s4, %s681_s19 }
  0x3a   : > { %p690_p4 = scmp.lt.u32.totalorder %s681_s19, %s938_s9 }
  0x3b   : > { %p685_p7 = pneg %p684_p5  ;;  %p689_p2 = por %p688_p1, %p687_p9 }
  0x3d   : > { %p691_p6 = por %p690_p4, %p689_p2 }
  0x3f   : > { %p692_p8 = pnand %p691_p6, %p685_p7 }
  0x41   : > { %695 = shalt.err (!%p692_p8)
}
  0x42   : > { %s696_s26 = scalar_lea.vmem %s940_s10, 128  ;;  %s802_s7 = smov [#allocation4]  }
  0x43   : > { %p697_p12 = scmp.ne.s32.totalorder %s940_s10, %s696_s26  ;;  %s701_s8 = sshll.u32 %s802_s7, 4  ;;  %s702_s8 = int_to_ptr.vmem [resolvable:$false] %s701_s8 }
  0x44   : > { %s703_s21 = scalar_lea.vmem %s702_s8, 256  ;;  %p704_p5 = scmp.lt.s32.totalorder %s940_s10, %s702_s8 }
  0x45   : > { %p699_p11 = pnand %p697_p12, %p683_p3  ;;  %p705_p9 = scmp.lt.s32.totalorder %s703_s21, %s696_s26 }
  0x47   : > { %p700_p0 = pneg %p699_p11  ;;  %p706_p1 = por %p705_p9, %p704_p5 }
  0x49   : > { %p707_p2 = pnand %p706_p1, %p700_p0 }
  0x4b   : > { %710 = shalt.err (!%p707_p2)
}
  0x4c   : > { %576 = dma.hbm_to_vmem [thread:$0]  (!%p944_p13), %s938_s9, 128, %s940_s10, %s178_s18  }
  0x4d   : > { %p1074_p7 = scmp.ne.s32.totalorder %s1068_s24, 0 }
  0x4e   : > { %s976_s19 = sand.u32 (!%p1074_p7), 1, %s781_s13   ;;  %p1075_p3 = scmp.ne.s32.totalorder (!%p1074_p7), %s1066_s22, 0 }
  0x4f   : > { %197 = sbr.rel (%p1074_p7) target bundleno = 783 (0x30f), region = 32  ;;  %s516_s25 = sshll.u32 (!%p1074_p7), %s976_s19, 3 }
  0x50   : > { %s200_s27 = scalar_lea.sflag (!%p1074_p7), [#allocation5], %s976_s19  ;;  %s203_s4 = scalar_lea.vmem (!%p1074_p7), [#allocation4], %s516_s25 }
  0x56   : > { %764 = dma.done.wait (%p1075_p3), %s200_s27, 128  }
  0x57   : > { %766 = vsyncadd (%p1075_p3), %s200_s27, 4294967168  ;;  %p1076_p13 = scmp.ne.s32.totalorder %s1064_s20, 0 }
  0x59   : > { %768 = dma.done.wait (%p1076_p13), [#allocation8], 1024  }
  0x5a   : > { %770 = vsyncadd (%p1076_p13), [#allocation8], 4294966272  ;;  %v990_v0 = vld [vmem:[%s203_s4] sm:$0xff]  ;;  %v803_v1 = vmov 0   ;;  %vm256_vm0 = vcmask 7168   ;;  %v641_v7 = vld [vmem:[#allocation7] sm:$0xff]  }
  0x5b   : > { %238 = vadd.xlane.f32.xlu0 %v990_v0  ;;  %639 = vset.pattern.permute.xlu1 %v803_v1  ;;  %v804_v8 = vmov 0.0   ;;  %v642_v9 = vld [vmem:[#allocation7 + $0x8] sm:$0xff]   ;;  %v643_v10 = vld [vmem:[#allocation7 + $0x10] sm:$0xff]   ;;  %v644_v11 = vld [vmem:[#allocation7 + $0x18] sm:$0xff]   ;;  %vm805_vm3 = vmmov 0   ;;  %s529_s24 = sshll.u32 %s789_s15, 7 }
  0x5c   : > { %640 = vset.pattern.permute.xlu0 %v803_v1  ;;  %541 = vmatprep.subr.bf16.mxu0 %v804_v8  ;;  %v645_v12 = vld [vmem:[#allocation7 + $0x20] sm:$0xff]   ;;  %v646_v13 = vld [vmem:[#allocation7 + $0x28] sm:$0xff]   ;;  %v647_v14 = vld [vmem:[#allocation7 + $0x30] sm:$0xff]   ;;  %s232_s9 = scalar_lea.vmem [#allocation9], %s516_s25  ;;  %s1007_s29 = scalar_lea.hbm %s1059_s3, %s529_s24 }
  0x5d   : > { %542 = vmatpush3.bf16.msra.mxu0 %v641_v7  ;;  %v648_v28 = vld [vmem:[#allocation7 + $0x38] sm:$0xff]   ;;  %557 = vmatprep.mubr.msk.bf16.mxu0 %vm805_vm3, %v804_v8  ;;  %v519_v34 = vld [vmem:[%s1058_s2] ss:$0 sm:$0xff]  ;;  %s404_s10 = sshll.u32 %s232_s9, 4  ;;  %s390_s15 = scalar_lea.sflag [#allocation6], %s976_s19  ;;  %s1009_s10 = int_to_ptr.vmem [resolvable:$true] %s404_s10 }
  0x5e   : > { %543 = vmatprep.subr.bf16.mxu0 %v804_v8  ;;  %s711_s6 = scalar_lea.vmem %s1009_s10, 128  ;;  %s806_s26 = smov [#allocation9]  }
  0x5f   : > { %p712_p4 = scmp.ne.s32.totalorder %s1009_s10, %s711_s6  ;;  %s715_s7 = sshll.u32 %s806_s26, 4  ;;  %s716_s7 = int_to_ptr.vmem [resolvable:$false] %s715_s7 }
  0x60   : > { %s717_s8 = scalar_lea.vmem %s716_s7, 256  ;;  %p718_p12 = scmp.lt.s32.totalorder %s1009_s10, %s716_s7 }
  0x61   : > { %544 = vmatpush3.bf16.msra.mxu0 %v642_v9  ;;  %p713_p6 = pnand %p712_p4, %p923_p10  ;;  %p719_p11 = scmp.lt.s32.totalorder %s717_s8, %s711_s6 }
  0x62   : > { %545 = vmatprep.subr.bf16.mxu0 %v804_v8 }
  0x63   : > { %p714_p8 = pneg %p713_p6  ;;  %p720_p0 = por %p719_p11, %p718_p12 }
  0x65   : > { %546 = vmatpush3.bf16.msra.mxu0 %v643_v10  ;;  %p721_p5 = pnand %p720_p0, %p714_p8 }
  0x66   : > { %547 = vmatprep.subr.bf16.mxu0 %v804_v8 }
  0x69   : > { %548 = vmatpush3.bf16.msra.mxu0 %v644_v11 }
  0x6a   : > { %549 = vmatprep.subr.bf16.mxu0 %v804_v8 }
  0x6d   : > { %550 = vmatpush3.bf16.msra.mxu0 %v645_v12 }
  0x6e   : > { %551 = vmatprep.subr.bf16.mxu0 %v804_v8 }
  0x71   : > { %552 = vmatpush3.bf16.msra.mxu0 %v646_v13 }
  0x72   : > { %553 = vmatprep.subr.bf16.mxu0 %v804_v8 }
  0x75   : > { %554 = vmatpush3.bf16.msra.mxu0 %v647_v14 }
  0x76   : > { %555 = vmatprep.subr.bf16.mxu0 %v804_v8 }
  0x79   : > { %556 = vmatpush3.bf16.msra.mxu0 %v648_v28 }
  0xe8   : > { %v239_v2 = vpop.xlane.xlu0 %238 }
  0xe9   : > { %v240_v3 = vmul.f32 0.03125, %v239_v2 }
  0xeb   : > { %257 = vst.msk [vmem:[#allocation2] sm:$0xff] %vm256_vm0, %v240_v3  ;;  %v241_v4 = vsub.f32 %v990_v0, %v240_v3  ;;  %v245_v15 = vmul.f32 %v240_v3, %v240_v3 }
  0xed   : > { %v242_v5 = vmul.f32 %v241_v4, %v241_v4  ;;  %v246_v16 = vmul.f32 96.0, %v245_v15 }
  0xef   : > { %243 = vadd.xlane.f32.xlu0 %v242_v5 }
  0xf2   : > { %v261_v6 = vld [vmem:[#allocation2] sm:$0xff] }
  0xf3   : > { %264 = vperm.xlu1 %639, %v261_v6  }
 0x172   : > { %v265_v29 = vpop.permute.xlu1 %264 }
 0x173   : > { %v267_v30 = vsub.f32 %v990_v0, %v265_v29 }
 0x17c   : > { %v244_v17 = vpop.xlane.xlu0 %243 }
 0x17d   : > { %v247_v18 = vsub.f32 %v244_v17, %v246_v16 }
 0x17f   : > { %v248_v19 = vmul.f32 0.032258064, %v247_v18 }
 0x181   : > { %649 = vrsqrt.f32 %v248_v19  ;;  %vm251_vm1 = vcmp.eq.f32.partialorder %v248_v19, inf  ;;  %v254_v22 = vand.u32 2147483648, %v248_v19  ;;  %vm253_vm2 = vcmp.eq.f32.partialorder %v248_v19, 0.0 }
 0x18b   : > { %v650_v20 = vpop.eup %649 }
 0x18c   : > { %v250_v21 = vmul.f32 %v650_v20, %v248_v19 }
 0x18e   : > { %v252_v23 = vsel %vm251_vm1, %v248_v19, %v250_v21 }
 0x18f   : > { %v255_v24 = vsel %vm253_vm2, %v254_v22, %v252_v23 }
 0x190   : > { %v258_v25 = vadd.f32 1e-06, %v255_v24 }
 0x192   : > { %651 = vrcp.f32 %v258_v25 }
 0x19c   : > { %v652_v26 = vpop.eup %651 }
 0x19d   : > { %260 = vst.msk [vmem:[#allocation3] sm:$0xff] %vm256_vm0, %v652_v26 }
 0x1a4   : > { %v268_v27 = vld [vmem:[#allocation3] sm:$0xff] }
 0x1a5   : > { %271 = vperm.xlu1 %639, %v268_v27  }
 0x224   : > { %v272_v31 = vpop.permute.xlu1 %271 }
 0x225   : > { %v274_v32 = vmul.f32 %v272_v31, %v267_v30 }
 0x227   : > { %v275_v33 = vpack.c.bf16 %v274_v32, %v274_v32 }
 0x229   : > { %558 = vmatmul.mubr.bf16.vlgmr.msra.gmra.mrb[0].mxu0 %v275_v33 }
 0x2fc   : > { %v381_v35 = vpop.f32.mrb[0].mxu0 }
 0x2fd   : > { %v382_v36 = vadd.f32 %v519_v34, %v381_v35  ;;  %v559_v37 = vpop.f32.mrb[1].mxu0 }
 0x2fe   : > { %v384_v38 = vpop.f32.mrb[2].mxu0 }
 0x2ff   : > { %v387_v39 = vadd.f32 %v382_v36, %v990_v0  ;;  %v560_v40 = vpop.f32.mrb[3].mxu0 }
 0x301   : > { %388 = vst [vmem:[%s232_s9] sm:$0xff] %v387_v39 }
 0x302   : > { %724 = shalt.err (!%p721_p5)
}
 0x303   : > { %s725_s21 = scalar_lea.hbm %s1007_s29, 128  ;;  %s729_s27 = scalar_lea.hbm %s1059_s3, 256 }
 0x304   : > { %p726_p9 = scmp.ne.s32.totalorder %s1007_s29, %s725_s21  ;;  %p730_p7 = scmp.lt.u32.totalorder %s1007_s29, %s1059_s3 }
 0x305   : > { %p731_p3 = scmp.lt.u32.totalorder %s729_s27, %s725_s21  ;;  %p733_p4 = scmp.lt.u32.totalorder %s725_s21, %s1007_s29 }
 0x306   : > { %p727_p1 = pnand %p726_p9, %p923_p10 }
 0x307   : > { %p732_p13 = por %p731_p3, %p730_p7 }
 0x308   : > { %p728_p2 = pneg %p727_p1 }
 0x309   : > { %p734_p6 = por %p733_p4, %p732_p13 }
 0x30b   : > { %p735_p8 = pnand %p734_p6, %p728_p2 }
 0x30d   : > { %738 = shalt.err (!%p735_p8)
}
 0x30e   : > { %567 = dma.vmem_to_hbm [thread:$0]  (%p923_p10), %s1009_s10, 128, %s1007_s29, %s390_s15  }
 0x30f PF: > { %s416_s22 = sand.u32 1, %s777_s12   ;;  %p1077_p12 = scmp.ne.s32.totalorder %s1067_s23, 0 }
 0x310   : > { %p1078_p11 = scmp.ge.s32.totalorder %s797_s17, 2  ;;  %s417_s24 = scalar_lea.sflag [#allocation6], %s416_s22 }
 0x312   : > { %p578_p0 = pnand %p1078_p11, %p1077_p12 }
 0x314   : > { %772 = dma.done.wait (!%p578_p0), %s417_s24, 128  }
 0x315   : > { %774 = vsyncadd (!%p578_p0), %s417_s24, 4294967168  ;;  %s20_s17 = sadd.s32 1, %s797_s17   ;;  %s1079_s12 = smov %s781_s13 }
 0x316   : > { %p17_p5 = scmp.ge.s32.totalorder %s20_s17, 4   ;;  %s1080_s13 = smov %s785_s14 }
 0x317   : > { %s1081_s14 = smov %s932_s5  ;;  %s1082_s15 = smov %s793_s16 }
 0x318   : > { %s1083_s16 = smov %s1085_s28  ;;  %19 = sbr.rel (!%p17_p5) target bundleno = 7 (0x7), region = 85 }
 0x31f   :  { %422 = vsyncpa [#allocation5], 1 }
 0x320   :  { %424 = vsyncpa [#allocation5 + $0x1], 1 }
 0x321   :  { %425 = vsyncpa [#allocation8], 1 }
 0x322   :  { %426 = vsyncpa [#allocation6], 1 }
 0x323   :  { %428 = vsyncpa [#allocation6 + $0x1], 1 }

</bundles_post_ra>
